<compile_context>
chip_gen: v6e
topology: v6e:2x2x1
jax: 0.10.0
libtpu: 0.0.40
codegen_flags: <defaults>
</compile_context>

<pallas_src>
import functools

import jax
import jax.numpy as jnp
from jax.experimental import pallas as pl
from jax.experimental.pallas import tpu as pltpu

_LANES = 128
_SUBLANES = 8


def _huber_kernel(x_ref, t_ref, w_ref, out_ref, *, delta, block_elems,
                  blocks_per_chunk, last_block, remaining, fold, has_overhang):
    """One (r, 128) tile: Huber(delta) * (weights + 1), folded and accumulated.

    Static (trace-time) params:
      block_elems      r * 128
      blocks_per_chunk inner-grid extent (for the global block id)
      last_block       index of the last *valid* block (tb - 1)
      remaining        number of valid elements in the last block (<= block_elems)
      fold             fold (r, 128) -> (8, 128) before accumulating
      has_overhang     chunk split produced iterations with gb > last_block
    """
    c = pl.program_id(0)          # chunk axis (parallel; extent 1 by default)
    b = pl.program_id(1)          # sequential block axis within the chunk
    gb = c * blocks_per_chunk + b  # global block id (may overhang last_block)

    # Zero this chunk's resident accumulator tile on its first step.
    @pl.when(b == 0)
    def _():
        out_ref[...] = jnp.zeros_like(out_ref)

    def compute():
        x = x_ref[...].astype(jnp.float32)
        t = t_ref[...].astype(jnp.float32)
        w = w_ref[...].astype(jnp.float32) + 1.0      # weights = targets[1] + 1
        d = x - t
        ad = jnp.abs(d)
        # F.huber_loss(reduction='none'):
        #   0.5*d^2 if |d| < delta else delta*(|d| - 0.5*delta)
        huber = jnp.where(ad < delta, 0.5 * d * d, delta * (ad - 0.5 * delta))
        return huber * w

    def accumulate(contrib):
        if fold:
            # (r, 128) -> (r//8, 8, 128): pure sublane-group relabeling, then a
            # leading-axis sum (VPU adds).  Keeps the accumulator at (8, 128).
            contrib = contrib.reshape(-1, _SUBLANES, _LANES).sum(axis=0)
        out_ref[...] += contrib

    full_last = (remaining == block_elems)

    if full_last:
        # Every valid block is completely full: no mask math anywhere.
        if has_overhang:
            @pl.when(gb <= last_block)
            def _():
                accumulate(compute())
        else:
            accumulate(compute())
    else:
        # Fast path: interior blocks, no mask math in the steady state.
        if last_block > 0:
            @pl.when(gb < last_block)
            def _():
                accumulate(compute())

        # Slow path: the single last block.  Mask by local index against the
        # static remaining-count scalar (no global index -> no i32 overflow).
        @pl.when(gb == last_block)
        def _():
            contrib = compute()
            row = jax.lax.broadcasted_iota(jnp.int32, contrib.shape, 0)
            col = jax.lax.broadcasted_iota(jnp.int32, contrib.shape, 1)
            contrib = jnp.where(row * _LANES + col < remaining, contrib, 0.0)
            accumulate(contrib)
        # Overhang blocks (gb > last_block) fall through: no accumulation.


def weighted_huber_loss(inputs, target_vals, target_weights, *, delta=1.0,
                        rows_per_block=4096, num_chunks=1,
                        vmem_limit_bytes=32 * 1024 * 1024):
    """Forward pass of WeightedHuberLoss, matching the PyTorch semantics.

    num_chunks=1 is right for single-TensorCore chips (v5e/v6e); on v7x you may
    try num_chunks=2 to shard the HBM stream across both TensorCores.
    """
    # Same broadcasting semantics as `huber_loss(inputs, targets[0]) * weights`.
    shape = jnp.broadcast_shapes(inputs.shape, target_vals.shape,
                                 target_weights.shape)
    x = jnp.broadcast_to(inputs, shape).reshape(-1)
    t = jnp.broadcast_to(target_vals, shape).reshape(-1)
    w = jnp.broadcast_to(target_weights, shape).reshape(-1)
    n = x.shape[0]

    # Lane-dense (rows, 128) view.  When n % 128 == 0 this is a free reshape
    # (no copy).  Otherwise only the sub-128 remainder is padded (a reshape
    # divisibility artifact; padded values are ignored by the in-kernel mask).
    # Callers with large tensors should prefer 128-divisible flattened sizes
    # to skip the pad copy entirely.
    rows = pl.cdiv(n, _LANES)
    pad = rows * _LANES - n
    if pad:
        x = jnp.pad(x, (0, pad))
        t = jnp.pad(t, (0, pad))
        w = jnp.pad(w, (0, pad))
    x2 = x.reshape(rows, _LANES)
    t2 = t.reshape(rows, _LANES)
    w2 = w.reshape(rows, _LANES)

    # Row tile: full extent when everything fits in one block (always a legal
    # block shape); otherwise an 8-aligned tile so blocks stay (8,128)-divisible.
    # Default r=4096 -> 3 inputs x 2 buffers x 2 MiB = 12 MiB of VMEM, inside
    # the 32 MiB scoped limit requested below on every generation.
    if rows <= rows_per_block:
        r = rows
    else:
        r = ((rows_per_block + _SUBLANES - 1) // _SUBLANES) * _SUBLANES
    tb = pl.cdiv(rows, r)                      # total row-blocks
    nc = max(1, min(num_chunks, tb))           # parallel chunks
    cpb = pl.cdiv(tb, nc)                      # blocks per chunk (inner axis)

    fold = (r % _SUBLANES == 0) and (r > _SUBLANES)
    acc_rows = _SUBLANES if (r % _SUBLANES == 0) else r
    remaining = n - (tb - 1) * r * _LANES      # valid elems in the last block

    def in_map(c, b):
        # Clamp so overhang iterations of the last chunk re-read a valid block;
        # the kernel skips accumulation for those iterations.
        return (jnp.minimum(c * cpb + b, tb - 1), 0)

    kernel = functools.partial(
        _huber_kernel, delta=float(delta), block_elems=r * _LANES,
        blocks_per_chunk=cpb, last_block=tb - 1, remaining=remaining,
        fold=fold, has_overhang=(nc * cpb != tb))

    in_bytes = n * (x2.dtype.itemsize + t2.dtype.itemsize + w2.dtype.itemsize)
    out_bytes = nc * acc_rows * _LANES * 4
    cost = pl.CostEstimate(flops=10 * n, transcendentals=0,
                           bytes_accessed=in_bytes + out_bytes)

    partials = pl.pallas_call(
        kernel,
        out_shape=jax.ShapeDtypeStruct((nc, acc_rows, _LANES), jnp.float32),
        grid=(nc, cpb),
        in_specs=[
            pl.BlockSpec((r, _LANES), in_map),
            pl.BlockSpec((r, _LANES), in_map),
            pl.BlockSpec((r, _LANES), in_map),
        ],
        out_specs=pl.BlockSpec((None, acc_rows, _LANES), lambda c, b: (c, 0, 0)),
        compiler_params=pltpu.CompilerParams(
            dimension_semantics=("parallel", "arbitrary"),
            vmem_limit_bytes=vmem_limit_bytes),
        cost_estimate=cost,
    )(x2, t2, w2)

    # Tiny cross-lane/cross-chunk reduce + mean over the true element count.
    return jnp.sum(partials) / n


def _reference(inputs, target_vals, target_weights, *, delta=1.0):
    """Pure-JAX reference mirroring the PyTorch forward exactly."""
    weights = target_weights + 1.0
    d = inputs - target_vals
    ad = jnp.abs(d)
    huber = jnp.where(ad < delta, 0.5 * d * d, delta * (ad - 0.5 * delta))
    return jnp.mean(huber * weights)


if __name__ == "__main__":
    key = jax.random.PRNGKey(0)
    k1, k2, k3 = jax.random.split(key, 3)

    # Case 1: tiny (N, 1) regression batch (the module's typical use);
    # exercises the <128-element masked tail with a single block.
    N = 8
    inputs = jax.random.normal(k1, (N, 1), dtype=jnp.float32)
    target_vals = inputs + 2.0 * jax.random.normal(k2, (N, 1), dtype=jnp.float32)
    target_weights = jax.random.uniform(k3, (N, 1), dtype=jnp.float32)
    loss = jax.block_until_ready(
        weighted_huber_loss(inputs, target_vals, target_weights))
    ref = _reference(inputs, target_vals, target_weights)
    assert jnp.allclose(loss, ref, atol=1e-5, rtol=1e-5), (loss, ref)

    # Case 2: ragged multi-block with a parallel chunk axis — exercises the
    # interior fast path, block-index clamping, overhang skip and the masked
    # last block.
    M = 5000
    k4, k5, k6 = jax.random.split(jax.random.PRNGKey(1), 3)
    x_b = jax.random.normal(k4, (M, 1), dtype=jnp.float32)
    t_b = 3.0 * jax.random.normal(k5, (M, 1), dtype=jnp.float32)
    w_b = jax.random.uniform(k6, (M, 1), dtype=jnp.float32)
    loss2 = jax.block_until_ready(
        weighted_huber_loss(x_b, t_b, w_b, rows_per_block=8, num_chunks=2))
    ref2 = _reference(x_b, t_b, w_b)
    assert jnp.allclose(loss2, ref2, atol=1e-5, rtol=1e-5), (loss2, ref2)

    # Case 3: 128-divisible input (zero-copy, no pad), sublane folding and the
    # fully unmasked fast path.
    k7, k8, k9 = jax.random.split(jax.random.PRNGKey(2), 3)
    x_c = jax.random.normal(k7, (256, 128), dtype=jnp.float32)
    t_c = jax.random.normal(k8, (256, 128), dtype=jnp.float32)
    w_c = jax.random.uniform(k9, (256, 128), dtype=jnp.float32)
    loss3 = jax.block_until_ready(weighted_huber_loss(x_c, t_c, w_c))
    ref3 = _reference(x_c, t_c, w_c)
    assert jnp.allclose(loss3, ref3, atol=1e-5, rtol=1e-5), (loss3, ref3)

    print("KERNEL_OK")
</pallas_src>

<mosaic_0001>
module attributes {stable_mosaic.version = 11 : i64} {
  func.func @_huber_kernel(%arg0: i32, %arg1: i32, %arg2: memref<1x128xf32, #tpu.memory_space<vmem>>, %arg3: memref<1x128xf32, #tpu.memory_space<vmem>>, %arg4: memref<1x128xf32, #tpu.memory_space<vmem>>, %arg5: memref<1x1x128xf32, #tpu.memory_space<vmem>>) attributes {dimension_semantics = [#tpu.dimension_semantics<parallel>, #tpu.dimension_semantics<arbitrary>], iteration_bounds = array<i64: 1, 1>, scalar_prefetch = 0 : i64, scratch_operands = 0 : i64, tpu.core_type = #tpu.core_type<tc>, window_params = [{transform_indices = @transform_0, window_bounds = array<i64: 1, 128>}, {transform_indices = @transform_1, window_bounds = array<i64: 1, 128>}, {transform_indices = @transform_2, window_bounds = array<i64: 1, 128>}, {transform_indices = @transform_3, window_bounds = array<i64: 1, 1, 128>}]} {
    %c1_i32 = arith.constant 1 : i32
    %0 = arith.muli %arg0, %c1_i32 : i32
    %1 = arith.addi %0, %arg1 : i32
    %c0_i32 = arith.constant 0 : i32
    %2 = arith.cmpi eq, %arg1, %c0_i32 : i32
    %3 = arith.extui %2 : i1 to i32
    %c0_i32_0 = arith.constant 0 : i32
    %4 = arith.cmpi ne, %3, %c0_i32_0 : i32
    scf.if %4 {
      %cst = arith.constant 0.000000e+00 : f32
      %8 = vector.broadcast %cst : f32 to vector<1x128xf32>
      %c0 = arith.constant 0 : index
      %c0_3 = arith.constant 0 : index
      %c0_4 = arith.constant 0 : index
      %9 = vector.load %arg5[%c0, %c0_3, %c0_4] : memref<1x1x128xf32, #tpu.memory_space<vmem>>, vector<1x1x128xf32>
      %10 = vector.shape_cast %9 : vector<1x1x128xf32> to vector<1x128xf32>
      %11 = vector.shape_cast %8 : vector<1x128xf32> to vector<1x1x128xf32>
      tpu.vector_store %arg5[%c0, %c0_3, %c0_4], %11 {strides = array<i32>} : memref<1x1x128xf32, #tpu.memory_space<vmem>>, vector<1x1x128xf32>,
    } else {
    }
    %c0_i32_1 = arith.constant 0 : i32
    %5 = arith.cmpi eq, %1, %c0_i32_1 : i32
    %6 = arith.extui %5 : i1 to i32
    %c0_i32_2 = arith.constant 0 : i32
    %7 = arith.cmpi ne, %6, %c0_i32_2 : i32
    scf.if %7 {
      %c0 = arith.constant 0 : index
      %c0_3 = arith.constant 0 : index
      %8 = vector.load %arg2[%c0, %c0_3] : memref<1x128xf32, #tpu.memory_space<vmem>>, vector<1x128xf32>
      %c0_4 = arith.constant 0 : index
      %c0_5 = arith.constant 0 : index
      %9 = vector.load %arg3[%c0_4, %c0_5] : memref<1x128xf32, #tpu.memory_space<vmem>>, vector<1x128xf32>
      %c0_6 = arith.constant 0 : index
      %c0_7 = arith.constant 0 : index
      %10 = vector.load %arg4[%c0_6, %c0_7] : memref<1x128xf32, #tpu.memory_space<vmem>>, vector<1x128xf32>
      %cst = arith.constant 1.000000e+00 : f32
      %11 = vector.broadcast %cst : f32 to vector<1x128xf32>
      %12 = arith.addf %10, %11 : vector<1x128xf32>
      %13 = arith.subf %8, %9 : vector<1x128xf32>
      %14 = math.absf %13 : vector<1x128xf32>
      %cst_8 = arith.constant 1.000000e+00 : f32
      %15 = vector.broadcast %cst_8 : f32 to vector<1x128xf32>
      %16 = arith.cmpf olt, %14, %15 : vector<1x128xf32>
      %cst_9 = arith.constant 5.000000e-01 : f32
      %17 = vector.broadcast %cst_9 : f32 to vector<1x128xf32>
      %18 = arith.mulf %17, %13 : vector<1x128xf32>
      %19 = arith.mulf %18, %13 : vector<1x128xf32>
      %cst_10 = arith.constant 5.000000e-01 : f32
      %20 = vector.broadcast %cst_10 : f32 to vector<1x128xf32>
      %21 = arith.subf %14, %20 : vector<1x128xf32>
      %cst_11 = arith.constant 1.000000e+00 : f32
      %22 = vector.broadcast %cst_11 : f32 to vector<1x128xf32>
      %23 = arith.mulf %22, %21 : vector<1x128xf32>
      %24 = arith.select %16, %19, %23 : vector<1x128xi1>, vector<1x128xf32>
      %25 = arith.mulf %24, %12 : vector<1x128xf32>
      %26 = tpu.iota {dimensions = array<i32: 0>} : vector<1x128xi32>
      %27 = tpu.iota {dimensions = array<i32: 1>} : vector<1x128xi32>
      %c128_i32 = arith.constant 128 : i32
      %28 = vector.broadcast %c128_i32 : i32 to vector<1x128xi32>
      %29 = arith.muli %26, %28 : vector<1x128xi32>
      %30 = arith.addi %29, %27 : vector<1x128xi32>
      %c8_i32 = arith.constant 8 : i32
      %31 = vector.broadcast %c8_i32 : i32 to vector<1x128xi32>
      %32 = arith.cmpi slt, %30, %31 : vector<1x128xi32>
      %cst_12 = arith.constant 0.000000e+00 : f32
      %33 = vector.broadcast %cst_12 : f32 to vector<1x128xf32>
      %34 = arith.select %32, %25, %33 : vector<1x128xi1>, vector<1x128xf32>
      %c0_13 = arith.constant 0 : index
      %c0_14 = arith.constant 0 : index
      %c0_15 = arith.constant 0 : index
      %35 = vector.load %arg5[%c0_13, %c0_14, %c0_15] : memref<1x1x128xf32, #tpu.memory_space<vmem>>, vector<1x1x128xf32>
      %36 = vector.shape_cast %35 : vector<1x1x128xf32> to vector<1x128xf32>
      %37 = arith.addf %36, %34 : vector<1x128xf32>
      %c0_16 = arith.constant 0 : index
      %c0_17 = arith.constant 0 : index
      %c0_18 = arith.constant 0 : index
      %38 = vector.load %arg5[%c0_16, %c0_17, %c0_18] : memref<1x1x128xf32, #tpu.memory_space<vmem>>, vector<1x1x128xf32>
      %39 = vector.shape_cast %38 : vector<1x1x128xf32> to vector<1x128xf32>
      %40 = vector.shape_cast %37 : vector<1x128xf32> to vector<1x1x128xf32>
      tpu.vector_store %arg5[%c0_16, %c0_17, %c0_18], %40 {strides = array<i32>} : memref<1x1x128xf32, #tpu.memory_space<vmem>>, vector<1x1x128xf32>,
    } else {
    }
    return
  }
  func.func @transform_0(%arg0: i32, %arg1: i32) -> (i32, i32) {
    %c1_i32 = arith.constant 1 : i32
    %0 = arith.muli %arg0, %c1_i32 : i32
    %1 = arith.addi %0, %arg1 : i32
    %c0_i32 = arith.constant 0 : i32
    %2 = arith.minsi %1, %c0_i32 : i32
    %c0_i32_0 = arith.constant 0 : i32
    %c0_i32_1 = arith.constant 0 : i32
    return %2, %c0_i32_0 : i32, i32
  }
  func.func @transform_1(%arg0: i32, %arg1: i32) -> (i32, i32) {
    %c1_i32 = arith.constant 1 : i32
    %0 = arith.muli %arg0, %c1_i32 : i32
    %1 = arith.addi %0, %arg1 : i32
    %c0_i32 = arith.constant 0 : i32
    %2 = arith.minsi %1, %c0_i32 : i32
    %c0_i32_0 = arith.constant 0 : i32
    %c0_i32_1 = arith.constant 0 : i32
    return %2, %c0_i32_0 : i32, i32
  }
  func.func @transform_2(%arg0: i32, %arg1: i32) -> (i32, i32) {
    %c1_i32 = arith.constant 1 : i32
    %0 = arith.muli %arg0, %c1_i32 : i32
    %1 = arith.addi %0, %arg1 : i32
    %c0_i32 = arith.constant 0 : i32
    %2 = arith.minsi %1, %c0_i32 : i32
    %c0_i32_0 = arith.constant 0 : i32
    %c0_i32_1 = arith.constant 0 : i32
    return %2, %c0_i32_0 : i32, i32
  }
  func.func @transform_3(%arg0: i32, %arg1: i32) -> (i32, i32, i32) {
    %c0_i32 = arith.constant 0 : i32
    %c0_i32_0 = arith.constant 0 : i32
    %c0_i32_1 = arith.constant 0 : i32
    return %arg0, %c0_i32, %c0_i32_0 : i32, i32, i32
  }
}

</mosaic_0001>

<bundles_post_ra>
// kernel: tpu_custom_call.1
= control target key start
LH: loop header
LB: loop body
LE: loop exit
PB: predicated region body
PF: predicated region fallthrough
CT: control target
= control target key end

     0   :  { %8 = vsyncpa [#allocation3], 0  ;;  %s222_s0 = inlined_call_operand.hbm [shape: f32[1,128], index: 0, kind: input, shape index: {}]   ;;  %s223_s1 = inlined_call_operand.vmem [shape: f32[1,128], index: 1, kind: input, shape index: {}]   ;;  %s224_s2 = inlined_call_operand.vmem [shape: f32[1,128], index: 2, kind: input, shape index: {}]   ;;  %s225_s3 = inlined_call_operand.hbm [shape: f32[1,1,128], index: 3, kind: output, shape index: {}]  }
   0x1   :  { %9 = vsyncpa [#allocation4], 0  ;;  %s187_s12 = smov [#allocation2]  }
   0x2   :  { %s21_s13 = sshll.u32 %s187_s12, 4  ;;  %s22_s13 = int_to_ptr.vmem [resolvable:$true] %s21_s13 }
   0x3   :  { %s151_s14 = scalar_lea.vmem %s22_s13, 16  ;;  %s155_s15 = scalar_lea.vmem %s22_s13, 32 }
   0x4   :  { %p152_p0 = scmp.ne.s32.totalorder %s22_s13, %s151_s14  ;;  %p156_p1 = scmp.lt.s32.totalorder %s22_s13, %s22_s13 }
   0x5   :  { %p157_p2 = scmp.lt.s32.totalorder %s155_s15, %s151_s14 }
   0x7   :  { %p158_p3 = por %p157_p2, %p156_p1 }
   0x9   :  { %p159_p4 = pnand %p158_p3, %p152_p0 }
   0xb   :  { %162 = shalt.err (!%p159_p4)
}
   0xc   :  { %24 = dma.hbm_to_vmem [thread:$0]  %s222_s0, 16, %s22_s13, [#allocation3]  }
   0xd   :  { %183 = dma.done.wait [#allocation3], 16  }
   0xe   :  { %184 = vsyncadd [#allocation3], 4294967280  ;;  %v105_v0 = vlaneseq  ;;  %v188_v1 = vmov 0.0   ;;  %v93_v5 = vld [vmem:[#allocation2] sm:$0x1]  ;;  %s189_s0 = smov [#allocation5]  }
   0xf   :  { %88 = vst [vmem:[#allocation5] sm:$0x1] %v188_v1  ;;  %v94_v6 = vld [vmem:[%s223_s1] sm:$0x1]  ;;  %s122_s22 = sshll.u32 %s189_s0, 4  ;;  %s123_s22 = int_to_ptr.vmem [resolvable:$true] %s122_s22 }
  0x10   :  { %v106_v2 = vshrl.u32 %v105_v0, 7  ;;  %v108_v3 = vand.u32 127, %v105_v0  ;;  %v95_v7 = vld [vmem:[%s224_s2] sm:$0x1]  ;;  %v97_v8 = vsub.f32 %v93_v5, %v94_v6  ;;  %s163_s1 = scalar_lea.vmem %s123_s22, 16  ;;  %s167_s2 = scalar_lea.vmem %s123_s22, 32 }
  0x11   :  { %v96_v12 = vadd.f32 1.0, %v95_v7  ;;  %p164_p5 = scmp.ne.s32.totalorder %s123_s22, %s163_s1  ;;  %p168_p6 = scmp.lt.s32.totalorder %s123_s22, %s123_s22 }
  0x12   :  { %v109_v4 = vmul.u32 128, %v106_v2  ;;  %v98_v9 = vand.u32 2147483647, %v97_v8  ;;  %v100_v10 = vmul.f32 0.5, %v97_v8  ;;  %p169_p7 = scmp.lt.s32.totalorder %s167_s2, %s163_s1 }
  0x14   :  { %v110_v11 = vadd.s32 %v109_v4, %v108_v3  ;;  %vm99_vm0 = vcmp.lt.f32.partialorder %v98_v9, 1.0  ;;  %v101_v13 = vmul.f32 %v100_v10, %v97_v8  ;;  %v139_v14 = vadd.f32 -0.5, %v98_v9  ;;  %p170_p8 = por %p169_p7, %p168_p6 }
  0x16   :  { %v103_v15 = vsel %vm99_vm0, %v101_v13, %v139_v14  ;;  %vm111_vm1 = vcmp.lt.s32.totalorder %v110_v11, 8  ;;  %v113_v17 = vld [vmem:[#allocation5] sm:$0x1]  ;;  %p171_p9 = pnand %p170_p8, %p164_p5 }
  0x17   :  { %v104_v16 = vmul.f32 %v103_v15, %v96_v12 }
  0x19   :  { %v112_v18 = vsel %vm111_vm1, %v104_v16, 0.0 }
  0x1a   :  { %v114_v19 = vadd.f32 %v113_v17, %v112_v18 }
  0x1c   :  { %115 = vst [vmem:[#allocation5] sm:$0x1] %v114_v19 }
  0x1d   :  { %174 = shalt.err (!%p171_p9)
}
  0x1e   :  { %125 = dma.vmem_to_hbm [thread:$0]  %s123_s22, 16, %s225_s3, [#allocation4]  }
  0x1f   :  { %185 = dma.done.wait [#allocation4], 16  }
  0x20   :  { %186 = vsyncadd [#allocation4], 4294967280 }
  0x21   :  { %129 = vsyncpa [#allocation3], 1 }
  0x22   :  { %130 = vsyncpa [#allocation4], 1 }

</bundles_post_ra>
